<compile_context>
chip_gen: v7x
topology: tpu7x:2x2x1
jax: 0.10.0
libtpu: 0.0.40
codegen_flags: <defaults>
</compile_context>

<pallas_src>
import functools

import jax
import jax.numpy as jnp
from jax.experimental import pallas as pl
from jax.experimental.pallas import tpu as pltpu


# ---------------------------------------------------------------------------
# helpers
# ---------------------------------------------------------------------------

def _round_up(x, m):
    return (x + m - 1) // m * m


def _pick_tile(dim, candidates):
    for c in candidates:
        if dim % c == 0:
            return c
    return dim


def _pick_time_block(T, max_tt=32):
    # Largest divisor of T that is <= max_tt (amortizes per-grid-step overhead).
    for tt in range(min(T, max_tt), 0, -1):
        if T % tt == 0:
            return tt
    return 1


def _pick_batch_block(Bp):
    # Prefer two batch blocks so v7x can shard the recurrence across its two
    # TensorCores; each half must still be >= 8 rows (f32 sublane tile).
    if Bp % 16 == 0:
        return Bp // 2
    return Bp


def _pad_gates_last(w, H, Hp):
    """Pad the gate-blocked last axis [i|f|g|o] from 4H to 4Hp (zeros per gate)."""
    if H == Hp:
        return w
    lead = w.shape[:-1]
    w4 = w.reshape(*lead, 4, H)
    w4 = jnp.pad(w4, [(0, 0)] * len(lead) + [(0, 0), (0, Hp - H)])
    return w4.reshape(*lead, 4 * Hp)


# ---------------------------------------------------------------------------
# Kernel 1: batched matmul + bias (+ optional sigmoid), fully parallel grid.
# Used for (a) the hoisted input projection and (b) the hoisted fc+sigmoid.
# ---------------------------------------------------------------------------

def _matmul_bias_kernel(a_ref, w_ref, b_ref, o_ref, *, apply_sigmoid):
    acc = jnp.dot(a_ref[...], w_ref[...], preferred_element_type=jnp.float32)
    acc = acc + b_ref[...]
    if apply_sigmoid:
        acc = jax.nn.sigmoid(acc)
    o_ref[...] = acc.astype(o_ref.dtype)


def matmul_bias_pallas(a, w, b, *, apply_sigmoid=False):
    """a: [M, K], w: [K, N], b: [1, N] -> [M, N].  M % 8 == 0, N % 128 == 0."""
    M, K = a.shape
    _, N = w.shape
    tm = _pick_tile(M, (512, 256, 128, 64, 32, 16, 8))
    tn = _pick_tile(N, (512, 256, 128))

    kernel = functools.partial(_matmul_bias_kernel, apply_sigmoid=apply_sigmoid)
    return pl.pallas_call(
        kernel,
        out_shape=jax.ShapeDtypeStruct((M, N), jnp.float32),
        grid_spec=pltpu.PrefetchScalarGridSpec(
            num_scalar_prefetch=0,
            grid=(M // tm, N // tn),
            in_specs=[
                pl.BlockSpec((tm, K), lambda i, j: (i, 0)),
                pl.BlockSpec((K, tn), lambda i, j: (0, j)),
                pl.BlockSpec((1, tn), lambda i, j: (0, j)),
            ],
            out_specs=pl.BlockSpec((tm, tn), lambda i, j: (i, j)),
        ),
        compiler_params=pltpu.CompilerParams(
            dimension_semantics=("parallel", "parallel"),
        ),
    )(a, w, b)


# ---------------------------------------------------------------------------
# Kernel 2: LSTM recurrence only.  Per grid step it processes a block of Tt
# time steps for one batch block; the input projection is already folded into
# gates_x, so each step is a single (Bc, Hp) @ (Hp, 4Hp) matmul + gate math.
# ---------------------------------------------------------------------------

def _lstm_block_kernel(gx_ref, whh_ref, h_out_ref, h_scr, c_scr,
                       *, hidden_pad, time_block):
    """
    gx_ref  : (Tt, Bc, 4Hp)  precomputed x@W_ih^T + b_ih + b_hh for this block
    whh_ref : (Hp, 4Hp)      hidden->gates weight (resident)
    h_out_ref: (Tt, Bc, Hp)  hidden states for this block
    h_scr/c_scr: (Bc, Hp)    state carried across time-blocks of one batch block
    """
    Hp = hidden_pad

    # Reset state at the first time-block of each batch block.
    @pl.when(pl.program_id(1) == 0)
    def _():
        h_scr[...] = jnp.zeros_like(h_scr)
        c_scr[...] = jnp.zeros_like(c_scr)

    whh = whh_ref[...]  # hoisted load, reused by every unrolled step

    def step(tt, carry):
        h_prev, c_prev = carry
        gates = gx_ref[tt] + jnp.dot(h_prev, whh,
                                     preferred_element_type=jnp.float32)
        # Gate slices start on 128-lane boundaries (Hp is a multiple of 128).
        i_g = jax.nn.sigmoid(gates[:, 0 * Hp:1 * Hp])
        f_g = jax.nn.sigmoid(gates[:, 1 * Hp:2 * Hp])
        g_g = jnp.tanh(gates[:, 2 * Hp:3 * Hp])
        o_g = jax.nn.sigmoid(gates[:, 3 * Hp:4 * Hp])
        c_new = f_g * c_prev + i_g * g_g
        h_new = o_g * jnp.tanh(c_new)
        h_out_ref[tt] = h_new
        return h_new, c_new

    h0 = h_scr[...]
    c0 = c_scr[...]
    h_last, c_last = jax.lax.fori_loop(0, time_block, step, (h0, c0),
                                       unroll=True)
    h_scr[...] = h_last
    c_scr[...] = c_last


def lstm_recurrence_pallas(gates_x_tm, w_hh_p, *, hidden_pad):
    """gates_x_tm: [T, Bp, 4Hp] time-major precomputed gates-from-input.
    w_hh_p: [Hp, 4Hp].  Returns hidden states [T, Bp, Hp]."""
    T, Bp, G = gates_x_tm.shape
    Hp = hidden_pad
    assert G == 4 * Hp

    Tt = _pick_time_block(T, 32)
    Bc = _pick_batch_block(Bp)
    nb = Bp // Bc
    nt = T // Tt

    kernel = functools.partial(_lstm_block_kernel,
                               hidden_pad=Hp, time_block=Tt)
    # NOTE: for realistic sizes on v7x (64 MiB VMEM) consider single-buffering
    # the resident W_hh (pipeline_mode=pl.Buffered(1)) and setting
    # vmem_limit_bytes explicitly; unnecessary at these shapes.
    return pl.pallas_call(
        kernel,
        out_shape=jax.ShapeDtypeStruct((T, Bp, Hp), jnp.float32),
        grid_spec=pltpu.PrefetchScalarGridSpec(
            num_scalar_prefetch=0,
            grid=(nb, nt),
            in_specs=[
                pl.BlockSpec((Tt, Bc, 4 * Hp), lambda b, t: (t, b, 0)),
                pl.BlockSpec((Hp, 4 * Hp), lambda b, t: (0, 0)),
            ],
            out_specs=pl.BlockSpec((Tt, Bc, Hp), lambda b, t: (t, b, 0)),
            scratch_shapes=[
                pltpu.VMEM((Bc, Hp), jnp.float32),  # h_t
                pltpu.VMEM((Bc, Hp), jnp.float32),  # c_t
            ],
        ),
        compiler_params=pltpu.CompilerParams(
            # batch blocks are independent (v7x megacore); time is sequential.
            dimension_semantics=("parallel", "arbitrary"),
        ),
    )(gates_x_tm, w_hh_p)


# ---------------------------------------------------------------------------
# Parameters + forward pass (mirrors DKT.forward)
# ---------------------------------------------------------------------------

def init_dkt_params(key, emb_dim, hidden_dim, num_skills):
    ks = jax.random.split(key, 8)
    scale = 0.1
    params = {
        "correct_embed": scale * jax.random.normal(ks[0], (2, emb_dim), jnp.float32),
        "difficult_emb": scale * jax.random.normal(ks[1], (4, emb_dim), jnp.float32),
        # PyTorch LSTM params stored pre-transposed: weight_ih^T (3E,4H),
        # weight_hh^T (H,4H), biases (4H,).  Gate order i,f,g,o.
        "w_ih_t": scale * jax.random.normal(ks[2], (3 * emb_dim, 4 * hidden_dim), jnp.float32),
        "w_hh_t": scale * jax.random.normal(ks[3], (hidden_dim, 4 * hidden_dim), jnp.float32),
        "b_ih": scale * jax.random.normal(ks[4], (4 * hidden_dim,), jnp.float32),
        "b_hh": scale * jax.random.normal(ks[5], (4 * hidden_dim,), jnp.float32),
        # fc: Linear(hidden_dim, num_skills), stored transposed (H,S).
        "w_fc_t": scale * jax.random.normal(ks[6], (hidden_dim, num_skills), jnp.float32),
        "b_fc": scale * jax.random.normal(ks[7], (num_skills,), jnp.float32),
    }
    return params


def dkt_forward(params, dynamic_skill_embeds, questions, correct_seq, diff):
    """Mirrors DKT.forward.

    dynamic_skill_embeds: [num_skills, emb_dim] f32
    questions, correct_seq, diff: [B, T] int32
    Returns (pred [B,T-1], mask [B,T-1], yt [B,T-1,S], yt_all [B,T,S], ht [B,T-1,S]).
    """
    mask = (questions[:, 1:] >= 2).astype(jnp.float32)

    # Embedding lookups + concat (glue, plain JAX).
    skill_embeds = jnp.take(dynamic_skill_embeds, questions, axis=0)          # [B,T,E]
    correct_embeds = jnp.take(params["correct_embed"], correct_seq, axis=0)   # [B,T,E]
    diff_emb = jnp.take(params["difficult_emb"], diff, axis=0)                # [B,T,E]
    lstm_input = jnp.concatenate([skill_embeds, correct_embeds, diff_emb], axis=-1)  # [B,T,3E]

    B, T, IN = lstm_input.shape
    H = params["w_hh_t"].shape[0]
    S = params["w_fc_t"].shape[1]

    # Pad to vreg-tile boundaries.
    Bp = _round_up(B, 8)      # f32 sublane
    Hp = _round_up(H, 128)    # 128-lane-aligned gate slices
    Sp = _round_up(S, 128)    # lane-dense fc output

    # --- padded weights ----------------------------------------------------
    w_ih_p = _pad_gates_last(params["w_ih_t"], H, Hp)                         # [3E,4Hp]
    w_hh_p = _pad_gates_last(params["w_hh_t"], H, Hp)                         # [H,4Hp]
    w_hh_p = jnp.pad(w_hh_p, ((0, Hp - H), (0, 0)))                           # [Hp,4Hp]
    b_comb_p = _pad_gates_last(params["b_ih"] + params["b_hh"], H, Hp)        # [4Hp]
    b_comb_p = b_comb_p.reshape(1, -1)                                        # [1,4Hp]
    w_fc_p = jnp.pad(params["w_fc_t"], ((0, Hp - H), (0, Sp - S)))            # [Hp,Sp]
    b_fc_p = jnp.pad(params["b_fc"], (0, Sp - S)).reshape(1, -1)              # [1,Sp]

    # --- padded, time-major input -------------------------------------------
    x_p = jnp.pad(lstm_input, ((0, Bp - B), (0, 0), (0, 0)))                  # [Bp,T,3E]
    x_tm = jnp.transpose(x_p, (1, 0, 2))                                      # [T,Bp,3E]
    x_flat = x_tm.reshape(T * Bp, IN)                                         # [T*Bp,3E]

    # 1) Hoisted input projection: one big MXU matmul, biases folded in.
    gates_x_flat = matmul_bias_pallas(x_flat, w_ih_p, b_comb_p,
                                      apply_sigmoid=False)                    # [T*Bp,4Hp]
    gates_x_tm = gates_x_flat.reshape(T, Bp, 4 * Hp)

    # 2) Serial LSTM recurrence (only h_prev @ W_hh per step).
    h_tm = lstm_recurrence_pallas(gates_x_tm, w_hh_p, hidden_pad=Hp)          # [T,Bp,Hp]

    # 3) Hoisted fc + sigmoid: one big lane-dense matmul.
    h_flat = h_tm.reshape(T * Bp, Hp)
    y_flat = matmul_bias_pallas(h_flat, w_fc_p, b_fc_p, apply_sigmoid=True)   # [T*Bp,Sp]

    yt_all = y_flat.reshape(T, Bp, Sp).transpose(1, 0, 2)[:B, :, :S]          # [B,T,S]

    yt = yt_all[:, :-1, :]
    ht = yt
    next_skill_ids = questions[:, 1:]
    pred = jnp.take_along_axis(yt, next_skill_ids[..., None], axis=2).squeeze(-1)
    # NOTE: single-layer nn.LSTM dropout is a no-op in PyTorch, so it is omitted.
    return pred, mask, yt, yt_all, ht


if __name__ == "__main__":
    emb_dim = 16
    hidden_dim = 32
    num_skills = 16
    batch = 2
    seq_len = 8

    key = jax.random.PRNGKey(0)
    k_param, k_skill, k_q, k_c, k_d = jax.random.split(key, 5)

    params = init_dkt_params(k_param, emb_dim, hidden_dim, num_skills)

    dynamic_skill_embeds = 0.1 * jax.random.normal(
        k_skill, (num_skills, emb_dim), jnp.float32)
    questions = jax.random.randint(k_q, (batch, seq_len), 0, num_skills, jnp.int32)
    correct_seq = jax.random.randint(k_c, (batch, seq_len), 0, 2, jnp.int32)
    diff = jax.random.randint(k_d, (batch, seq_len), 0, 4, jnp.int32)

    pred, mask, yt, yt_all, ht = dkt_forward(
        params, dynamic_skill_embeds, questions, correct_seq, diff)
    jax.block_until_ready((pred, mask, yt, yt_all, ht))

    assert pred.shape == (batch, seq_len - 1)
    assert mask.shape == (batch, seq_len - 1)
    assert yt.shape == (batch, seq_len - 1, num_skills)
    assert yt_all.shape == (batch, seq_len, num_skills)
    assert ht.shape == (batch, seq_len - 1, num_skills)
    assert bool(jnp.all(jnp.isfinite(pred)))
    assert bool(jnp.all((pred >= 0.0) & (pred <= 1.0)))

    print("KERNEL_OK")
</pallas_src>

<mosaic_0001>
module attributes {stable_mosaic.version = 11 : i64} {
  func.func @_matmul_bias_kernel(%arg0: i32, %arg1: i32, %arg2: memref<64x48xf32, #tpu.memory_space<vmem>>, %arg3: memref<48x512xf32, #tpu.memory_space<vmem>>, %arg4: memref<1x512xf32, #tpu.memory_space<vmem>>, %arg5: memref<64x512xf32, #tpu.memory_space<vmem>>) attributes {dimension_semantics = [#tpu.dimension_semantics<parallel>, #tpu.dimension_semantics<parallel>], iteration_bounds = array<i64: 1, 1>, scalar_prefetch = 0 : i64, scratch_operands = 0 : i64, tpu.core_type = #tpu.core_type<tc>, window_params = [{transform_indices = @transform_0, window_bounds = array<i64: 64, 48>}, {transform_indices = @transform_1, window_bounds = array<i64: 48, 512>}, {transform_indices = @transform_2, window_bounds = array<i64: 1, 512>}, {transform_indices = @transform_3, window_bounds = array<i64: 64, 512>}]} {
    %c0 = arith.constant 0 : index
    %c0_0 = arith.constant 0 : index
    %0 = vector.load %arg2[%c0, %c0_0] : memref<64x48xf32, #tpu.memory_space<vmem>>, vector<64x48xf32>
    %c0_1 = arith.constant 0 : index
    %c0_2 = arith.constant 0 : index
    %1 = vector.load %arg3[%c0_1, %c0_2] : memref<48x512xf32, #tpu.memory_space<vmem>>, vector<48x512xf32>
    %cst = arith.constant dense<0.000000e+00> : vector<64x512xf32>
    %2 = tpu.matmul %0, %1, %cst {dimension_numbers = #tpu.dot_dimension_numbers<[1], [0], [0], [1], [0, 0, 1, 1], [], []>} : vector<64x48xf32>, vector<48x512xf32>, vector<64x512xf32> -> vector<64x512xf32>
    %c0_3 = arith.constant 0 : index
    %c0_4 = arith.constant 0 : index
    %3 = vector.load %arg4[%c0_3, %c0_4] : memref<1x512xf32, #tpu.memory_space<vmem>>, vector<1x512xf32>
    %4 = vector.broadcast %3 : vector<1x512xf32> to vector<64x512xf32>
    %5 = arith.addf %2, %4 : vector<64x512xf32>
    %c0_5 = arith.constant 0 : index
    %c0_6 = arith.constant 0 : index
    %6 = vector.load %arg5[%c0_5, %c0_6] : memref<64x512xf32, #tpu.memory_space<vmem>>, vector<64x512xf32>
    tpu.vector_store %arg5[%c0_5, %c0_6], %5 {strides = array<i32>} : memref<64x512xf32, #tpu.memory_space<vmem>>, vector<64x512xf32>,
    return
  }
  func.func @transform_0(%arg0: i32, %arg1: i32) -> (i32, i32) {
    %c0_i32 = arith.constant 0 : i32
    %c0_i32_0 = arith.constant 0 : i32
    return %arg0, %c0_i32 : i32, i32
  }
  func.func @transform_1(%arg0: i32, %arg1: i32) -> (i32, i32) {
    %c0_i32 = arith.constant 0 : i32
    %c0_i32_0 = arith.constant 0 : i32
    return %c0_i32, %arg1 : i32, i32
  }
  func.func @transform_2(%arg0: i32, %arg1: i32) -> (i32, i32) {
    %c0_i32 = arith.constant 0 : i32
    %c0_i32_0 = arith.constant 0 : i32
    return %c0_i32, %arg1 : i32, i32
  }
  func.func @transform_3(%arg0: i32, %arg1: i32) -> (i32, i32) {
    %c0_i32 = arith.constant 0 : i32
    return %arg0, %arg1 : i32, i32
  }
}

</mosaic_0001>

<bundles_post_ra>
// kernel: tpu_custom_call.1
= control target key start
LH: loop header
LB: loop body
LE: loop exit
PB: predicated region body
PF: predicated region fallthrough
CT: control target
= control target key end

     0   :  { %8 = vsyncpa [#allocation3], 0  ;;  %s630_s0 = inlined_call_operand.vmem [shape: f32[64,48], index: 0, kind: input, shape index: {}]   ;;  %s631_s1 = inlined_call_operand.hbm [shape: f32[48,512], index: 1, kind: input, shape index: {}]   ;;  %s632_s2 = inlined_call_operand.vmem [shape: f32[1,512], index: 2, kind: input, shape index: {}]   ;;  %s633_s3 = inlined_call_operand.hbm [shape: f32[64,512], index: 3, kind: output, shape index: {}]  }
   0x1   :  { %9 = vsyncpa [#allocation4], 0  ;;  %s476_s12 = smov [#allocation2]   ;;  %s428_s16 = scalar_lea.hbm %s631_s1, 3072 }
   0x2   :  { %s17_s13 = sshll.u32 %s476_s12, 4  ;;  %p429_p0 = scmp.ne.s32.totalorder %s631_s1, %s428_s16  ;;  %s18_s13 = int_to_ptr.vmem [resolvable:$true] %s17_s13 }
   0x3   :  { %p432_p1 = scmp.lt.u32.totalorder %s428_s16, %s631_s1 }
   0x5   :  { %p434_p2 = pnand %p432_p1, %p429_p0 }
   0x7   :  { %437 = shalt.err (!%p434_p2)
}
   0x8   :  { %s438_s21 = scalar_lea.vmem %s18_s13, 3072  ;;  %p443_p4 = scmp.lt.s32.totalorder %s18_s13, %s18_s13 }
   0x9   :  { %p439_p3 = scmp.ne.s32.totalorder %s18_s13, %s438_s21  ;;  %p444_p5 = scmp.lt.s32.totalorder %s438_s21, %s438_s21 }
   0xb   :  { %p445_p6 = por %p444_p5, %p443_p4 }
   0xd   :  { %p446_p7 = pnand %p445_p6, %p439_p3 }
   0xf   :  { %449 = shalt.err (!%p446_p7)
}
  0x10   :  { %s477_s22 = smov 512   ;;  %s478_s23 = smov 32  }
  0x11   :  { %23 = dma.hbm_to_vmem [thread:$0]  %s631_s1, 3072, %s18_s13, [#allocation3], %s477_s22, %s477_s22, %s478_s23  }
  0x12   :  { %472 = dma.done.wait [#allocation3], 3072  }
  0x13   :  { %473 = vsyncadd [#allocation3], 4294964224  ;;  %v479_v0 = vmov 0.0   ;;  %v38_v1 = vld [vmem:[#allocation2 + $0x8] sm:$0xff]  ;;  %v40_v3 = vld [vmem:[#allocation2 + $0x18] sm:$0xff]  ;;  %vm83_vm0 = vcmask 392192   ;;  %v63_v45 = vlaneseq }
  0x14   :  { %172 = vmatprep.mubr.f32.mxu0 %v479_v0  ;;  %285 = vmatprep.mubr.f32.mxu1 %v479_v0  ;;  %v42_v2 = vld [vmem:[#allocation2 + $0x28] sm:$0xff]  ;;  %v44_v5 = vld [vmem:[#allocation2 + $0x38] sm:$0xff]  ;;  %v37_v6 = vld [vmem:[#allocation2] sm:$0xff] }
  0x15   :  { %v399_v4 = vpack.c.bf16 %v42_v2, %v38_v1  ;;  %v41_v7 = vld [vmem:[#allocation2 + $0x20] sm:$0xff]  ;;  %v411_v8 = vpack.c.bf16 %v44_v5, %v40_v3  ;;  %v39_v10 = vld [vmem:[#allocation2 + $0x10] sm:$0xff]  ;;  %v46_v12 = vld [vmem:[#allocation2 + $0x48] sm:$0xff]  ;;  %v64_v46 = vshrl.u32 %v63_v45, 7 }
  0x16   :  { %v401_v9 = vpack.c.bf16 %v41_v7, %v37_v6  ;;  %v43_v11 = vld [vmem:[#allocation2 + $0x30] sm:$0xff]  ;;  %v50_v14 = vld [vmem:[#allocation2 + $0x68] sm:$0xff]  ;;  %v48_v15 = vld [vmem:[#allocation2 + $0x58] sm:$0xff] }
  0x17   :  { %400 = vmatprep.subr.bf16.mxu0 %v399_v4  ;;  %v413_v13 = vpack.c.bf16 %v43_v11, %v39_v10  ;;  %v52_v16 = vld [vmem:[#allocation2 + $0x78] sm:$0xff]  ;;  %412 = vmatprep.subr.bf16.mxu1 %v411_v8  ;;  %v403_v17 = vpack.c.bf16 %v50_v14, %v46_v12  ;;  %v45_v19 = vld [vmem:[#allocation2 + $0x40] sm:$0xff]  ;;  %v47_v21 = vld [vmem:[#allocation2 + $0x50] sm:$0xff]  ;;  %v65_v47 = vsub.s32 0, %v64_v46  ;;  %v73_v49 = vsub.s32 2, %v64_v46 }
  0x18   :  { %402 = vmatpush1.bf16.msra.mxu0 %v401_v9  ;;  %v415_v18 = vpack.c.bf16 %v52_v16, %v48_v15  ;;  %v49_v20 = vld [vmem:[#allocation2 + $0x60] sm:$0xff]  ;;  %v51_v23 = vld [vmem:[#allocation2 + $0x70] sm:$0xff]  ;;  %v54_v24 = vld [vmem:[#allocation2 + $0x88] sm:$0xff]  ;;  %v69_v50 = vsub.s32 1, %v64_v46  ;;  %v77_v51 = vsub.s32 3, %v64_v46 }
  0x19   :  { %414 = vmatpush1.bf16.msra.mxu1 %v413_v13  ;;  %v405_v22 = vpack.c.bf16 %v49_v20, %v45_v19  ;;  %v58_v25 = vld [vmem:[#allocation2 + $0xa8] sm:$0xff]  ;;  %404 = vmatprep.subr.bf16.mxu0 %v403_v17  ;;  %v417_v26 = vpack.c.bf16 %v51_v23, %v47_v21  ;;  %v56_v28 = vld [vmem:[#allocation2 + $0x98] sm:$0xff]  ;;  %v53_v30 = vld [vmem:[#allocation2 + $0x80] sm:$0xff] }
  0x1a   :  { %416 = vmatprep.subr.bf16.mxu1 %v415_v18  ;;  %v407_v27 = vpack.c.bf16 %v58_v25, %v54_v24  ;;  %v60_v29 = vld [vmem:[#allocation2 + $0xb8] sm:$0xff]  ;;  %v57_v32 = vld [vmem:[#allocation2 + $0xa0] sm:$0xff]  ;;  %v55_v33 = vld [vmem:[#allocation2 + $0x90] sm:$0xff] }
  0x1b   :  { %v419_v31 = vpack.c.bf16 %v60_v29, %v56_v28  ;;  %v59_v34 = vld [vmem:[#allocation2 + $0xb0] sm:$0xff]  ;;  %v409_v35 = vpack.c.bf16 %v57_v32, %v53_v30  ;;  %v29_v37 = vld [vmem:[%s630_s0] sm:$0xff]  ;;  %v30_v38 = vld [vmem:[%s630_s0 + $0x8] sm:$0xff] }
  0x1c   :  { %406 = vmatpush1.bf16.msra.mxu0 %v405_v22  ;;  %v421_v36 = vpack.c.bf16 %v59_v34, %v55_v33  ;;  %v31_v39 = vld [vmem:[%s630_s0 + $0x10] sm:$0xff]  ;;  %v32_v40 = vld [vmem:[%s630_s0 + $0x18] sm:$0xff]  ;;  %v33_v41 = vld [vmem:[%s630_s0 + $0x20] sm:$0xff] }
  0x1d   :  { %418 = vmatpush1.bf16.msra.mxu1 %v417_v26  ;;  %408 = vmatprep.subr.bf16.mxu0 %v407_v27  ;;  %v34_v42 = vld [vmem:[%s630_s0 + $0x28] sm:$0xff]  ;;  %v35_v43 = vld [vmem:[%s630_s0 + $0x30] sm:$0xff]  ;;  %v36_v44 = vld [vmem:[%s630_s0 + $0x38] sm:$0xff]  ;;  %s480_s0 = smov [#allocation5]  }
  0x1e   :  { %420 = vmatprep.subr.bf16.mxu1 %v419_v31  ;;  %v61_v48 = vld [vmem:[%s632_s2] sm:$0xf]  ;;  %s371_s2 = sshll.u32 %s480_s0, 4  ;;  %s372_s2 = int_to_ptr.vmem [resolvable:$true] %s371_s2 }
  0x1f   :  { %v575_v52 = vrot.slane %v61_v48, %v65_v47  ;;  %v577_v53 = vrot.slane %v61_v48, %v73_v49  ;;  %v579_v54 = vrot.slane %v61_v48, %v69_v50  ;;  %v581_v55 = vrot.slane %v61_v48, %v77_v51  ;;  %s450_s16 = scalar_lea.vmem %s372_s2, 4096  ;;  %p455_p9 = scmp.lt.s32.totalorder %s372_s2, %s372_s2 }
  0x20   :  { %410 = vmatpush1.bf16.msra.mxu0 %v409_v35  ;;  %p451_p8 = scmp.ne.s32.totalorder %s372_s2, %s450_s16  ;;  %p456_p10 = scmp.lt.s32.totalorder %s450_s16, %s450_s16 }
  0x21   :  { %422 = vmatpush1.bf16.msra.mxu1 %v421_v36 }
  0x22   :  { %p457_p11 = por %p456_p10, %p455_p9 }
  0x23   :  { %383 = vmatmul.mubr.msk.f32.vlgmr.msra.gmra.mrb[0].mxu0 %vm83_vm0, %v29_v37 }
  0x24   :  { %391 = vmatmul.mubr.msk.f32.vlgmr.msra.gmra.mrb[0].mxu1 %vm83_vm0, %v29_v37  ;;  %178 = vmatprep.mubr.f32.mxu0 %v479_v0  ;;  %p458_p12 = pnand %p457_p11, %p451_p8 }
  0x25   :  { %291 = vmatprep.mubr.f32.mxu1 %v479_v0 }
  0x27   :  { %384 = vmatmul.mubr.msk.f32.gmra.mrb[2].mxu0 %vm83_vm0, %v30_v38 }
  0x28   :  { %392 = vmatmul.mubr.msk.f32.gmra.mrb[2].mxu1 %vm83_vm0, %v30_v38  ;;  %184 = vmatprep.mubr.f32.mxu0 %v479_v0 }
  0x29   :  { %297 = vmatprep.mubr.f32.mxu1 %v479_v0 }
  0x2b   :  { %385 = vmatmul.mubr.msk.f32.gmra.mrb[4].mxu0 %vm83_vm0, %v31_v39 }
  0x2c   :  { %393 = vmatmul.mubr.msk.f32.gmra.mrb[4].mxu1 %vm83_vm0, %v31_v39  ;;  %190 = vmatprep.mubr.f32.mxu0 %v479_v0 }
  0x2d   :  { %303 = vmatprep.mubr.f32.mxu1 %v479_v0 }
  0x2f   :  { %386 = vmatmul.mubr.msk.f32.gmra.mrb[6].mxu0 %vm83_vm0, %v32_v40 }
  0x30   :  { %394 = vmatmul.mubr.msk.f32.gmra.mrb[6].mxu1 %vm83_vm0, %v32_v40  ;;  %196 = vmatprep.mubr.f32.mxu0 %v479_v0 }
  0x31   :  { %309 = vmatprep.mubr.f32.mxu1 %v479_v0 }
  0x33   :  { %387 = vmatmul.mubr.msk.f32.gmra.mrb[8].mxu0 %vm83_vm0, %v33_v41 }
  0x34   :  { %395 = vmatmul.mubr.msk.f32.gmra.mrb[8].mxu1 %vm83_vm0, %v33_v41  ;;  %202 = vmatprep.mubr.f32.mxu0 %v479_v0 }
  0x35   :  { %315 = vmatprep.mubr.f32.mxu1 %v479_v0 }
  0x37   :  { %388 = vmatmul.mubr.msk.f32.gmra.mrb[10].mxu0 %vm83_vm0, %v34_v42 }
  0x38   :  { %396 = vmatmul.mubr.msk.f32.gmra.mrb[10].mxu1 %vm83_vm0, %v34_v42  ;;  %208 = vmatprep.mubr.f32.mxu0 %v479_v0 }
  0x39   :  { %321 = vmatprep.mubr.f32.mxu1 %v479_v0 }
  0x3b   :  { %389 = vmatmul.mubr.msk.f32.gmra.mrb[12].mxu0 %vm83_vm0, %v35_v43 }
  0x3c   :  { %397 = vmatmul.mubr.msk.f32.gmra.mrb[12].mxu1 %vm83_vm0, %v35_v43  ;;  %214 = vmatprep.mubr.f32.mxu0 %v479_v0 }
  0x3d   :  { %327 = vmatprep.mubr.f32.mxu1 %v479_v0 }
  0x3f   :  { %390 = vmatmul.mubr.msk.f32.gmra.mrb[14].mxu0 %vm83_vm0, %v36_v44 }
  0x40   :  { %398 = vmatmul.mubr.msk.f32.gmra.mrb[14].mxu1 %vm83_vm0, %v36_v44 }
  0xf6   :  { %v174_v56 = vpop.f32.mrb[0].mxu0 }
  0xf7   :  { %v175_v57 = vadd.f32 %v174_v56, %v575_v52  ;;  %v287_v58 = vpop.f32.mrb[0].mxu1  ;;  %v176_v59 = vpop.f32.mrb[1].mxu0 }
  0xf8   :  { %v288_v60 = vadd.f32 %v287_v58, %v577_v53  ;;  %v177_v61 = vadd.f32 %v176_v59, %v579_v54  ;;  %v289_v62 = vpop.f32.mrb[1].mxu1 }
  0xf9   :  { %334 = vst [vmem:[#allocation5] sm:$0xff] %v175_v57  ;;  %v290_v63 = vadd.f32 %v289_v62, %v581_v55 }
  0xfa   :  { %336 = vst [vmem:[#allocation5 + $0x10] sm:$0xff] %v288_v60  ;;  %335 = vst [vmem:[#allocation5 + $0x8] sm:$0xff] %v177_v61  ;;  %v180_v0 = vpop.f32.mrb[2].mxu0 }
  0xfb   :  { %337 = vst [vmem:[#allocation5 + $0x18] sm:$0xff] %v290_v63  ;;  %v181_v1 = vadd.f32 %v180_v0, %v575_v52  ;;  %v293_v2 = vpop.f32.mrb[2].mxu1  ;;  %v182_v3 = vpop.f32.mrb[3].mxu0 }
  0xfc   :  { %v294_v4 = vadd.f32 %v293_v2, %v577_v53  ;;  %v183_v5 = vadd.f32 %v182_v3, %v579_v54  ;;  %v295_v6 = vpop.f32.mrb[3].mxu1 }
  0xfd   :  { %338 = vst [vmem:[#allocation5 + $0x20] sm:$0xff] %v181_v1  ;;  %v296_v7 = vadd.f32 %v295_v6, %v581_v55 }
  0xfe   :  { %340 = vst [vmem:[#allocation5 + $0x30] sm:$0xff] %v294_v4  ;;  %339 = vst [vmem:[#allocation5 + $0x28] sm:$0xff] %v183_v5  ;;  %v186_v8 = vpop.f32.mrb[4].mxu0 }
  0xff   :  { %341 = vst [vmem:[#allocation5 + $0x38] sm:$0xff] %v296_v7  ;;  %v187_v9 = vadd.f32 %v186_v8, %v575_v52  ;;  %v299_v10 = vpop.f32.mrb[4].mxu1  ;;  %v188_v11 = vpop.f32.mrb[5].mxu0 }
 0x100   :  { %v300_v12 = vadd.f32 %v299_v10, %v577_v53  ;;  %v189_v13 = vadd.f32 %v188_v11, %v579_v54  ;;  %v301_v14 = vpop.f32.mrb[5].mxu1 }
 0x101   :  { %342 = vst [vmem:[#allocation5 + $0x40] sm:$0xff] %v187_v9  ;;  %v302_v15 = vadd.f32 %v301_v14, %v581_v55 }
 0x102   :  { %344 = vst [vmem:[#allocation5 + $0x50] sm:$0xff] %v300_v12  ;;  %343 = vst [vmem:[#allocation5 + $0x48] sm:$0xff] %v189_v13  ;;  %v192_v16 = vpop.f32.mrb[6].mxu0 }
 0x103   :  { %345 = vst [vmem:[#allocation5 + $0x58] sm:$0xff] %v302_v15  ;;  %v193_v17 = vadd.f32 %v192_v16, %v575_v52  ;;  %v305_v18 = vpop.f32.mrb[6].mxu1  ;;  %v194_v19 = vpop.f32.mrb[7].mxu0 }
 0x104   :  { %v306_v20 = vadd.f32 %v305_v18, %v577_v53  ;;  %v195_v21 = vadd.f32 %v194_v19, %v579_v54  ;;  %v307_v22 = vpop.f32.mrb[7].mxu1 }
 0x105   :  { %346 = vst [vmem:[#allocation5 + $0x60] sm:$0xff] %v193_v17  ;;  %v308_v23 = vadd.f32 %v307_v22, %v581_v55 }
 0x106   :  { %348 = vst [vmem:[#allocation5 + $0x70] sm:$0xff] %v306_v20  ;;  %347 = vst [vmem:[#allocation5 + $0x68] sm:$0xff] %v195_v21  ;;  %v198_v24 = vpop.f32.mrb[8].mxu0 }
 0x107   :  { %349 = vst [vmem:[#allocation5 + $0x78] sm:$0xff] %v308_v23  ;;  %v199_v25 = vadd.f32 %v198_v24, %v575_v52  ;;  %v311_v26 = vpop.f32.mrb[8].mxu1  ;;  %v200_v27 = vpop.f32.mrb[9].mxu0 }
 0x108   :  { %v312_v28 = vadd.f32 %v311_v26, %v577_v53  ;;  %v201_v29 = vadd.f32 %v200_v27, %v579_v54  ;;  %v313_v30 = vpop.f32.mrb[9].mxu1 }
 0x109   :  { %350 = vst [vmem:[#allocation5 + $0x80] sm:$0xff] %v199_v25  ;;  %v314_v31 = vadd.f32 %v313_v30, %v581_v55 }
 0x10a   :  { %352 = vst [vmem:[#allocation5 + $0x90] sm:$0xff] %v312_v28  ;;  %351 = vst [vmem:[#allocation5 + $0x88] sm:$0xff] %v201_v29  ;;  %v204_v32 = vpop.f32.mrb[10].mxu0 }
 0x10b   :  { %353 = vst [vmem:[#allocation5 + $0x98] sm:$0xff] %v314_v31  ;;  %v205_v33 = vadd.f32 %v204_v32, %v575_v52  ;;  %v317_v34 = vpop.f32.mrb[10].mxu1  ;;  %v206_v35 = vpop.f32.mrb[11].mxu0 }
 0x10c   :  { %v318_v36 = vadd.f32 %v317_v34, %v577_v53  ;;  %v207_v37 = vadd.f32 %v206_v35, %v579_v54  ;;  %v319_v38 = vpop.f32.mrb[11].mxu1 }
 0x10d   :  { %354 = vst [vmem:[#allocation5 + $0xa0] sm:$0xff] %v205_v33  ;;  %v320_v39 = vadd.f32 %v319_v38, %v581_v55 }
 0x10e   :  { %356 = vst [vmem:[#allocation5 + $0xb0] sm:$0xff] %v318_v36  ;;  %355 = vst [vmem:[#allocation5 + $0xa8] sm:$0xff] %v207_v37  ;;  %v210_v40 = vpop.f32.mrb[12].mxu0 }
 0x10f   :  { %357 = vst [vmem:[#allocation5 + $0xb8] sm:$0xff] %v320_v39  ;;  %v211_v41 = vadd.f32 %v210_v40, %v575_v52  ;;  %v323_v42 = vpop.f32.mrb[12].mxu1  ;;  %v212_v43 = vpop.f32.mrb[13].mxu0 }
 0x110   :  { %v324_v44 = vadd.f32 %v323_v42, %v577_v53  ;;  %v213_v45 = vadd.f32 %v212_v43, %v579_v54  ;;  %v325_v46 = vpop.f32.mrb[13].mxu1 }
 0x111   :  { %358 = vst [vmem:[#allocation5 + $0xc0] sm:$0xff] %v211_v41  ;;  %v326_v47 = vadd.f32 %v325_v46, %v581_v55 }
 0x112   :  { %360 = vst [vmem:[#allocation5 + $0xd0] sm:$0xff] %v324_v44  ;;  %359 = vst [vmem:[#allocation5 + $0xc8] sm:$0xff] %v213_v45  ;;  %v216_v48 = vpop.f32.mrb[14].mxu0 }
 0x113   :  { %361 = vst [vmem:[#allocation5 + $0xd8] sm:$0xff] %v326_v47  ;;  %v217_v49 = vadd.f32 %v216_v48, %v575_v52  ;;  %v329_v50 = vpop.f32.mrb[14].mxu1  ;;  %v218_v51 = vpop.f32.mrb[15].mxu0 }
 0x114   :  { %v330_v56 = vadd.f32 %v329_v50, %v577_v53  ;;  %v219_v57 = vadd.f32 %v218_v51, %v579_v54  ;;  %v331_v58 = vpop.f32.mrb[15].mxu1 }
 0x115   :  { %362 = vst [vmem:[#allocation5 + $0xe0] sm:$0xff] %v217_v49  ;;  %v332_v59 = vadd.f32 %v331_v58, %v581_v55 }
 0x116   :  { %364 = vst [vmem:[#allocation5 + $0xf0] sm:$0xff] %v330_v56  ;;  %363 = vst [vmem:[#allocation5 + $0xe8] sm:$0xff] %v219_v57 }
 0x117   :  { %365 = vst [vmem:[#allocation5 + $0xf8] sm:$0xff] %v332_v59 }
 0x118   :  { %461 = shalt.err (!%p458_p12)
}
 0x119   :  { %s462_s19 = scalar_lea.hbm %s633_s3, 4096 }
 0x11a   :  { %p463_p13 = scmp.ne.s32.totalorder %s633_s3, %s462_s19  ;;  %p466_p0 = scmp.lt.u32.totalorder %s462_s19, %s633_s3 }
 0x11c   :  { %p468_p1 = pnand %p466_p0, %p463_p13 }
 0x11e   :  { %471 = shalt.err (!%p468_p1)
}
 0x11f   :  { %377 = dma.vmem_to_hbm [thread:$0]  %s372_s2, 4096, %s633_s3, [#allocation4], %s477_s22, %s477_s22, %s478_s23  }
 0x120   :  { %474 = dma.done.wait [#allocation4], 4096  }
 0x121   :  { %475 = vsyncadd [#allocation4], 4294963200 }
 0x122   :  { %381 = vsyncpa [#allocation3], 1 }
 0x123   :  { %382 = vsyncpa [#allocation4], 1 }

</bundles_post_ra>
